<compile_context>
chip_gen: v5e
topology: v5e:2x2
jax: 0.10.0
libtpu: 0.0.40
codegen_flags: <defaults>
</compile_context>

<pallas_src>
import math
import functools

import jax
import jax.numpy as jnp
from jax import lax
from jax.experimental import pallas as pl
from jax.experimental.pallas import tpu as pltpu


def _round_up(x, m):
    return ((x + m - 1) // m) * m


def _attention_layer_kernel(q_ref, k_ref, v_ref, wq_ref, wk_ref, wv_ref,
                            wh_ref, out_ref, *opt_attn_ref,
                            d_kp, n_head, Lk, compute_dtype):
    """Grid = (B, n_q_blocks).  One grid step handles every head for one
    (batch, q-block): fused lane-padded q/k projections, one shared V
    projection, per-head softmax attention (statically unrolled), head-sum,
    output projection.

    wq_ref is pre-scaled by 1/sqrt(d_k) and zero-padded per head to d_kp lanes;
    wh_ref is pre-scaled by 1/n_head (head mean folded in)."""
    attn_ref = opt_attn_ref[0] if opt_attn_ref else None

    q = q_ref[0]                 # (tq, d_model)  compute_dtype
    k = k_ref[0]                 # (Lk, d_model)
    v = v_ref[0]                 # (Lk, d_model)

    # Fused projections: one matmul for all heads (128-lane-aligned per-head
    # column blocks), f32 accumulation on the MXU.
    qa = jnp.dot(q, wq_ref[...], preferred_element_type=jnp.float32)   # (tq, H*d_kp)
    ka = jnp.dot(k, wk_ref[...], preferred_element_type=jnp.float32)   # (Lk, H*d_kp)
    # Shared V projection: computed once, reused by every head.
    vs = jnp.dot(v, wv_ref[...], preferred_element_type=jnp.float32)   # (Lk, d_v)
    vs = vs.astype(compute_dtype)

    acc = None
    for h in range(n_head):                               # static unroll
        qs = qa[:, h * d_kp:(h + 1) * d_kp].astype(compute_dtype)   # lane-aligned
        ks = ka[:, h * d_kp:(h + 1) * d_kp].astype(compute_dtype)

        # scores = qs @ ks^T (contraction over padded head dim; zero-padded
        # lanes contribute nothing).  No transpose materialized.
        scores = lax.dot_general(qs, ks, (((1,), (1,)), ((), ())),
                                 preferred_element_type=jnp.float32)  # (tq, Lk)

        # Softmax over keys (1/sqrt(d_k) already folded into Wq).  f32.
        m = jnp.max(scores, axis=-1, keepdims=True)
        e = jnp.exp(scores - m)
        s = jnp.sum(e, axis=-1, keepdims=True)
        r = pl.reciprocal(s, approx=True)                 # EUP slot
        r = r * (2.0 - s * r)                             # one Newton step
        p = e * r                                         # (tq, Lk) f32

        if attn_ref is not None:
            # Direct per-head store: no concat, no H-wide live range, lets the
            # vst slot drain while the next head's MXU work runs.
            attn_ref[0, :, h * Lk:(h + 1) * Lk] = p.astype(attn_ref.dtype)

        head = jnp.dot(p.astype(compute_dtype), vs,
                       preferred_element_type=jnp.float32)            # (tq, d_v)
        acc = head if acc is None else acc + head

    # Head mean folded into Wh (pre-scaled by 1/n_head).
    out_ref[0] = jnp.dot(acc.astype(compute_dtype), wh_ref[...],
                         preferred_element_type=jnp.float32).astype(out_ref.dtype)


def _vmem_resident_bytes(qb, *, Lk, d_model, n_head, d_kp, d_v,
                         in_bytes, out_bytes, attn_bytes, output_attention):
    """Rough double-buffered-blocks + in-kernel-temporaries VMEM estimate."""
    hdkp = n_head * d_kp
    blocks = (2 * qb * d_model * in_bytes               # q block (x2 buffers)
              + 2 * 2 * Lk * d_model * in_bytes         # k + v blocks (x2)
              + (2 * d_model * hdkp + d_model * d_v + d_v * d_model) * in_bytes  # weights (Buffered(1))
              + 2 * qb * d_model * out_bytes)           # out block (x2)
    if output_attention:
        blocks += 2 * qb * n_head * Lk * attn_bytes     # attn block (x2)
    temps = ((qb + Lk) * hdkp * 4 + Lk * d_v * 4        # qa, ka, vs (f32)
             + 3 * qb * Lk * 4 + qb * d_v * 4)          # scores/e/p + acc (f32)
    return blocks + temps


def _pick_q_block(Lq, B, requested, bytes_fn, budget):
    if requested is not None:
        qb = min(requested, Lq)
    else:
        qb = min(Lq, 512)
        while qb > 8 and bytes_fn(qb) > budget:
            qb = max(8, qb // 2)
    if qb >= Lq:
        # v7x has 2 TensorCores: avoid a degenerate 1-step grid for B==1.
        if B == 1 and Lq >= 16 and (Lq // 2) % 8 == 0:
            return Lq // 2
        return Lq
    qb = max(8, (qb // 8) * 8)
    while qb > 8 and Lq % qb != 0:
        qb -= 8
    if Lq % qb != 0:
        qb = Lq
    return qb


def attention_layer_pallas(q, k, v, wq, wk, wv, wh, *, n_head,
                           q_block=None,
                           compute_dtype=jnp.bfloat16,
                           attn_dtype=jnp.bfloat16,
                           output_attention=True,
                           vmem_budget_bytes=44 << 20):
    """q, k, v: [B, L, d_model]; wq, wk: [H, d_model, d_k]; wv: [d_model, d_v];
    wh: [d_v, d_model].  Returns (outputs [B, Lq, d_model],
    attn [B, Lq, H, Lk] or None if output_attention=False)."""
    B, Lq, d_model = q.shape
    Lk = k.shape[1]
    d_k = d_model // n_head
    d_v = d_k
    d_kp = _round_up(d_k, 128)           # lane-aligned per-head column block
    hdkp = n_head * d_kp

    # ---- host-side weight prep (tiny, one-time XLA ops) ----
    scale = 1.0 / math.sqrt(d_k)
    wq_p = jnp.pad(jnp.transpose(wq, (1, 0, 2)) * scale,
                   ((0, 0), (0, 0), (0, d_kp - d_k)))
    wq_cat = wq_p.reshape(d_model, hdkp).astype(compute_dtype)
    wk_p = jnp.pad(jnp.transpose(wk, (1, 0, 2)),
                   ((0, 0), (0, 0), (0, d_kp - d_k)))
    wk_cat = wk_p.reshape(d_model, hdkp).astype(compute_dtype)
    wv_c = wv.astype(compute_dtype)
    wh_c = (wh * (1.0 / n_head)).astype(compute_dtype)

    q_c = q.astype(compute_dtype)
    k_c = k.astype(compute_dtype)
    v_c = v.astype(compute_dtype)

    in_bytes = jnp.dtype(compute_dtype).itemsize
    out_bytes = jnp.dtype(q.dtype).itemsize
    attn_bytes = jnp.dtype(attn_dtype).itemsize

    bytes_fn = functools.partial(
        _vmem_resident_bytes, Lk=Lk, d_model=d_model, n_head=n_head,
        d_kp=d_kp, d_v=d_v, in_bytes=in_bytes, out_bytes=out_bytes,
        attn_bytes=attn_bytes, output_attention=output_attention)

    q_block = _pick_q_block(Lq, B, q_block, bytes_fn, vmem_budget_bytes)
    n_qb = Lq // q_block

    vmem_need = bytes_fn(q_block)
    vmem_limit = int(min(max(vmem_need * 5 // 4 + (4 << 20), 32 << 20), 56 << 20))

    kernel = functools.partial(_attention_layer_kernel, d_kp=d_kp,
                               n_head=n_head, Lk=Lk,
                               compute_dtype=compute_dtype)

    def _const_spec(shape):
        # Grid-invariant weight block: single buffer (no wasted double-buffer).
        return pl.BlockSpec(shape, lambda b, i: (0, 0),
                            pipeline_mode=pl.Buffered(1))

    in_specs = [
        pl.BlockSpec((1, q_block, d_model), lambda b, i: (b, i, 0)),   # q
        pl.BlockSpec((1, Lk, d_model), lambda b, i: (b, 0, 0)),        # k
        pl.BlockSpec((1, Lk, d_model), lambda b, i: (b, 0, 0)),        # v
        _const_spec((d_model, hdkp)),                                  # Wq (cat, scaled, padded)
        _const_spec((d_model, hdkp)),                                  # Wk (cat, padded)
        _const_spec((d_model, d_v)),                                   # Wv (shared)
        _const_spec((d_v, d_model)),                                   # Wh (head-mean folded)
    ]

    out_shape = [jax.ShapeDtypeStruct((B, Lq, d_model), q.dtype)]
    out_specs = [pl.BlockSpec((1, q_block, d_model), lambda b, i: (b, i, 0))]
    if output_attention:
        out_shape.append(jax.ShapeDtypeStruct((B, Lq, n_head * Lk), attn_dtype))
        out_specs.append(
            pl.BlockSpec((1, q_block, n_head * Lk), lambda b, i: (b, i, 0)))

    results = pl.pallas_call(
        kernel,
        out_shape=tuple(out_shape),
        grid_spec=pltpu.PrefetchScalarGridSpec(
            num_scalar_prefetch=0,
            grid=(B, n_qb),
            in_specs=in_specs,
            out_specs=tuple(out_specs),
        ),
        compiler_params=pltpu.CompilerParams(
            dimension_semantics=("parallel", "parallel"),
            vmem_limit_bytes=vmem_limit),
    )(q_c, k_c, v_c, wq_cat, wk_cat, wv_c, wh_c)

    if output_attention:
        out, attn_flat = results
        # Free row-major reshape: [B, Lq, H*Lk] -> [B, Lq, H, Lk]
        # (matches torch.stack(attns, dim=2)).
        attn = attn_flat.reshape(B, Lq, n_head, Lk)
        return out, attn
    out = results[0] if isinstance(results, (tuple, list)) else results
    return out, None


def _xavier_uniform(key, shape):
    # matches torch.nn.init.xavier_uniform_ for a [fan_out, fan_in] Linear weight
    fan_out, fan_in = shape
    bound = math.sqrt(6.0 / (fan_in + fan_out))
    return jax.random.uniform(key, shape, jnp.float32, minval=-bound, maxval=bound)


def _reference(q, k, v, wq, wk, wv, wh, n_head):
    d_k = q.shape[-1] // n_head
    heads, attns = [], []
    for h in range(n_head):
        qs = q @ wq[h]
        ks = k @ wk[h]
        vs = v @ wv
        sc = (qs @ jnp.swapaxes(ks, -1, -2)) / math.sqrt(d_k)
        a = jax.nn.softmax(sc, axis=-1)
        heads.append(a @ vs)
        attns.append(a)
    head = jnp.stack(heads, axis=2) if n_head > 1 else heads[0]
    attn = jnp.stack(attns, axis=2)
    outputs = jnp.mean(head, axis=2) if n_head > 1 else head
    outputs = outputs @ wh
    return outputs, attn


if __name__ == "__main__":
    # small shapes consistent with the module
    B, L, d_model, n_head = 2, 8, 32, 4
    d_k = d_v = d_model // n_head

    root = jax.random.PRNGKey(0)
    keys = jax.random.split(root, 3 + 2 * n_head + 2)

    q = jax.random.normal(keys[0], (B, L, d_model), jnp.float32)
    k = jax.random.normal(keys[1], (B, L, d_model), jnp.float32)
    v = jax.random.normal(keys[2], (B, L, d_model), jnp.float32)

    # per-head q/k projection weights (torch Linear weight shape [d_k, d_model]),
    # pre-transposed to [d_model, d_k] for right-multiplication.
    wq = jnp.stack([_xavier_uniform(keys[3 + i], (d_k, d_model)).T
                    for i in range(n_head)])
    wk = jnp.stack([_xavier_uniform(keys[3 + n_head + i], (d_k, d_model)).T
                    for i in range(n_head)])
    wv = _xavier_uniform(keys[3 + 2 * n_head], (d_v, d_model)).T   # shared v_layer
    wh = _xavier_uniform(keys[4 + 2 * n_head], (d_model, d_v)).T   # output projection

    out_ref_, attn_ref_ = _reference(q, k, v, wq, wk, wv, wh, n_head)

    # 1) exact-precision path (f32 compute, f32 attn) -- tight correctness check.
    out32, attn32 = attention_layer_pallas(
        q, k, v, wq, wk, wv, wh, n_head=n_head,
        compute_dtype=jnp.float32, attn_dtype=jnp.float32)
    jax.block_until_ready((out32, attn32))
    assert out32.shape == (B, L, d_model) and attn32.shape == (B, L, n_head, L)
    assert jnp.allclose(out32, out_ref_, atol=1e-4, rtol=1e-4)
    assert jnp.allclose(attn32, attn_ref_, atol=1e-4, rtol=1e-4)

    # 2) performance defaults (bf16 MXU operands, bf16 attn writeback).
    out16, attn16 = attention_layer_pallas(q, k, v, wq, wk, wv, wh, n_head=n_head)
    jax.block_until_ready((out16, attn16))
    assert jnp.allclose(out16, out_ref_, atol=1e-1, rtol=1e-1)
    assert jnp.allclose(attn16.astype(jnp.float32), attn_ref_, atol=5e-2, rtol=5e-2)

    # 3) attention-weights writeback skipped (Informer's output_attention=False).
    out_na, attn_na = attention_layer_pallas(
        q, k, v, wq, wk, wv, wh, n_head=n_head, output_attention=False)
    jax.block_until_ready(out_na)
    assert attn_na is None
    assert jnp.allclose(out_na, out_ref_, atol=1e-1, rtol=1e-1)

    # TODO(synk): mask != None path and train-mode dropout are not implemented
    # (the module is exercised with mask=None; dropout is eval-mode identity).
    print("KERNEL_OK")
</pallas_src>

<mosaic_0001>
module attributes {stable_mosaic.version = 11 : i64} {
  func.func @_attention_layer_kernel(%arg0: i32, %arg1: i32, %arg2: memref<1x8x32xf32, #tpu.memory_space<vmem>>, %arg3: memref<1x8x32xf32, #tpu.memory_space<vmem>>, %arg4: memref<1x8x32xf32, #tpu.memory_space<vmem>>, %arg5: memref<32x512xf32, #tpu.memory_space<vmem>>, %arg6: memref<32x512xf32, #tpu.memory_space<vmem>>, %arg7: memref<32x8xf32, #tpu.memory_space<vmem>>, %arg8: memref<8x32xf32, #tpu.memory_space<vmem>>, %arg9: memref<1x8x32xf32, #tpu.memory_space<vmem>>, %arg10: memref<1x8x32xf32, #tpu.memory_space<vmem>>) attributes {dimension_semantics = [#tpu.dimension_semantics<parallel>, #tpu.dimension_semantics<parallel>], iteration_bounds = array<i64: 2, 1>, scalar_prefetch = 0 : i64, scratch_operands = 0 : i64, tpu.core_type = #tpu.core_type<tc>, window_params = [{transform_indices = @transform_0, window_bounds = array<i64: 1, 8, 32>}, {transform_indices = @transform_1, window_bounds = array<i64: 1, 8, 32>}, {transform_indices = @transform_2, window_bounds = array<i64: 1, 8, 32>}, {pipeline_mode = #tpu.pipeline_mode<synchronous>, transform_indices = @transform_3, window_bounds = array<i64: 32, 512>}, {pipeline_mode = #tpu.pipeline_mode<synchronous>, transform_indices = @transform_4, window_bounds = array<i64: 32, 512>}, {pipeline_mode = #tpu.pipeline_mode<synchronous>, transform_indices = @transform_5, window_bounds = array<i64: 32, 8>}, {pipeline_mode = #tpu.pipeline_mode<synchronous>, transform_indices = @transform_6, window_bounds = array<i64: 8, 32>}, {transform_indices = @transform_7, window_bounds = array<i64: 1, 8, 32>}, {transform_indices = @transform_8, window_bounds = array<i64: 1, 8, 32>}]} {
    %c0 = arith.constant 0 : index
    %c0_0 = arith.constant 0 : index
    %c0_1 = arith.constant 0 : index
    %0 = vector.load %arg2[%c0, %c0_0, %c0_1] : memref<1x8x32xf32, #tpu.memory_space<vmem>>, vector<1x8x32xf32>
    %1 = vector.shape_cast %0 : vector<1x8x32xf32> to vector<8x32xf32>
    %c0_2 = arith.constant 0 : index
    %c0_3 = arith.constant 0 : index
    %c0_4 = arith.constant 0 : index
    %2 = vector.load %arg3[%c0_2, %c0_3, %c0_4] : memref<1x8x32xf32, #tpu.memory_space<vmem>>, vector<1x8x32xf32>
    %3 = vector.shape_cast %2 : vector<1x8x32xf32> to vector<8x32xf32>
    %c0_5 = arith.constant 0 : index
    %c0_6 = arith.constant 0 : index
    %c0_7 = arith.constant 0 : index
    %4 = vector.load %arg4[%c0_5, %c0_6, %c0_7] : memref<1x8x32xf32, #tpu.memory_space<vmem>>, vector<1x8x32xf32>
    %5 = vector.shape_cast %4 : vector<1x8x32xf32> to vector<8x32xf32>
    %c0_8 = arith.constant 0 : index
    %c0_9 = arith.constant 0 : index
    %6 = vector.load %arg5[%c0_8, %c0_9] : memref<32x512xf32, #tpu.memory_space<vmem>>, vector<32x512xf32>
    %cst = arith.constant dense<0.000000e+00> : vector<8x512xf32>
    %7 = tpu.matmul %1, %6, %cst {dimension_numbers = #tpu.dot_dimension_numbers<[1], [0], [0], [1], [0, 0, 1, 1], [], []>} : vector<8x32xf32>, vector<32x512xf32>, vector<8x512xf32> -> vector<8x512xf32>
    %c0_10 = arith.constant 0 : index
    %c0_11 = arith.constant 0 : index
    %8 = vector.load %arg6[%c0_10, %c0_11] : memref<32x512xf32, #tpu.memory_space<vmem>>, vector<32x512xf32>
    %cst_12 = arith.constant dense<0.000000e+00> : vector<8x512xf32>
    %9 = tpu.matmul %3, %8, %cst_12 {dimension_numbers = #tpu.dot_dimension_numbers<[1], [0], [0], [1], [0, 0, 1, 1], [], []>} : vector<8x32xf32>, vector<32x512xf32>, vector<8x512xf32> -> vector<8x512xf32>
    %c0_13 = arith.constant 0 : index
    %c0_14 = arith.constant 0 : index
    %10 = vector.load %arg7[%c0_13, %c0_14] : memref<32x8xf32, #tpu.memory_space<vmem>>, vector<32x8xf32>
    %cst_15 = arith.constant dense<0.000000e+00> : vector<8x8xf32>
    %11 = tpu.matmul %5, %10, %cst_15 {dimension_numbers = #tpu.dot_dimension_numbers<[1], [0], [0], [1], [0, 0, 1, 1], [], []>} : vector<8x32xf32>, vector<32x8xf32>, vector<8x8xf32> -> vector<8x8xf32>
    %12 = vector.extract_strided_slice %7 {offsets = [0, 0], sizes = [8, 128], strides = [1, 1]} : vector<8x512xf32> to vector<8x128xf32>
    %13 = vector.extract_strided_slice %9 {offsets = [0, 0], sizes = [8, 128], strides = [1, 1]} : vector<8x512xf32> to vector<8x128xf32>
    %cst_16 = arith.constant dense<0.000000e+00> : vector<8x8xf32>
    %14 = tpu.matmul %12, %13, %cst_16 {dimension_numbers = #tpu.dot_dimension_numbers<[1], [1], [0], [0], [0, 0, 1, 0], [], []>} : vector<8x128xf32>, vector<8x128xf32>, vector<8x8xf32> -> vector<8x8xf32>
    %cst_17 = arith.constant dense<0xFF800000> : vector<8xf32>
    %15 = vector.multi_reduction <maximumf>, %14, %cst_17 [1] : vector<8x8xf32> to vector<8xf32>
    %16 = vector.shape_cast %15 : vector<8xf32> to vector<8x1xf32>
    %17 = vector.broadcast %16 : vector<8x1xf32> to vector<8x8xf32>
    %18 = arith.subf %14, %17 : vector<8x8xf32>
    %19 = math.exp %18 : vector<8x8xf32>
    %cst_18 = arith.constant dense<0.000000e+00> : vector<8xf32>
    %20 = vector.multi_reduction <add>, %19, %cst_18 [1] : vector<8x8xf32> to vector<8xf32>
    %21 = vector.shape_cast %20 : vector<8xf32> to vector<8x1xf32>
    %22 = tpu.reciprocal %21 {approx = true} : vector<8x1xf32> -> vector<8x1xf32>
    %23 = arith.mulf %21, %22 : vector<8x1xf32>
    %cst_19 = arith.constant 2.000000e+00 : f32
    %24 = vector.broadcast %cst_19 : f32 to vector<8x1xf32>
    %25 = arith.subf %24, %23 : vector<8x1xf32>
    %26 = arith.mulf %22, %25 : vector<8x1xf32>
    %27 = vector.broadcast %26 : vector<8x1xf32> to vector<8x8xf32>
    %28 = arith.mulf %19, %27 : vector<8x8xf32>
    %c0_20 = arith.constant 0 : index
    %c0_21 = arith.constant 0 : index
    %c0_22 = arith.constant 0 : index
    %29 = vector.load %arg10[%c0_20, %c0_21, %c0_22] : memref<1x8x32xf32, #tpu.memory_space<vmem>>, vector<1x8x8xf32>
    %30 = vector.shape_cast %29 : vector<1x8x8xf32> to vector<8x8xf32>
    %31 = vector.shape_cast %28 : vector<8x8xf32> to vector<1x8x8xf32>
    tpu.vector_store %arg10[%c0_20, %c0_21, %c0_22], %31 {strides = array<i32>} : memref<1x8x32xf32, #tpu.memory_space<vmem>>, vector<1x8x8xf32>,
    %cst_23 = arith.constant dense<0.000000e+00> : vector<8x8xf32>
    %32 = tpu.matmul %28, %11, %cst_23 {dimension_numbers = #tpu.dot_dimension_numbers<[1], [0], [0], [1], [0, 0, 1, 1], [], []>} : vector<8x8xf32>, vector<8x8xf32>, vector<8x8xf32> -> vector<8x8xf32>
    %33 = vector.extract_strided_slice %7 {offsets = [0, 128], sizes = [8, 128], strides = [1, 1]} : vector<8x512xf32> to vector<8x128xf32>
    %34 = vector.extract_strided_slice %9 {offsets = [0, 128], sizes = [8, 128], strides = [1, 1]} : vector<8x512xf32> to vector<8x128xf32>
    %cst_24 = arith.constant dense<0.000000e+00> : vector<8x8xf32>
    %35 = tpu.matmul %33, %34, %cst_24 {dimension_numbers = #tpu.dot_dimension_numbers<[1], [1], [0], [0], [0, 0, 1, 0], [], []>} : vector<8x128xf32>, vector<8x128xf32>, vector<8x8xf32> -> vector<8x8xf32>
    %cst_25 = arith.constant dense<0xFF800000> : vector<8xf32>
    %36 = vector.multi_reduction <maximumf>, %35, %cst_25 [1] : vector<8x8xf32> to vector<8xf32>
    %37 = vector.shape_cast %36 : vector<8xf32> to vector<8x1xf32>
    %38 = vector.broadcast %37 : vector<8x1xf32> to vector<8x8xf32>
    %39 = arith.subf %35, %38 : vector<8x8xf32>
    %40 = math.exp %39 : vector<8x8xf32>
    %cst_26 = arith.constant dense<0.000000e+00> : vector<8xf32>
    %41 = vector.multi_reduction <add>, %40, %cst_26 [1] : vector<8x8xf32> to vector<8xf32>
    %42 = vector.shape_cast %41 : vector<8xf32> to vector<8x1xf32>
    %43 = tpu.reciprocal %42 {approx = true} : vector<8x1xf32> -> vector<8x1xf32>
    %44 = arith.mulf %42, %43 : vector<8x1xf32>
    %cst_27 = arith.constant 2.000000e+00 : f32
    %45 = vector.broadcast %cst_27 : f32 to vector<8x1xf32>
    %46 = arith.subf %45, %44 : vector<8x1xf32>
    %47 = arith.mulf %43, %46 : vector<8x1xf32>
    %48 = vector.broadcast %47 : vector<8x1xf32> to vector<8x8xf32>
    %49 = arith.mulf %40, %48 : vector<8x8xf32>
    %c0_28 = arith.constant 0 : index
    %c0_29 = arith.constant 0 : index
    %c8 = arith.constant 8 : index
    %50 = vector.load %arg10[%c0_28, %c0_29, %c8] : memref<1x8x32xf32, #tpu.memory_space<vmem>>, vector<1x8x8xf32>
    %51 = vector.shape_cast %50 : vector<1x8x8xf32> to vector<8x8xf32>
    %52 = vector.shape_cast %49 : vector<8x8xf32> to vector<1x8x8xf32>
    tpu.vector_store %arg10[%c0_28, %c0_29, %c8], %52 {strides = array<i32>} : memref<1x8x32xf32, #tpu.memory_space<vmem>>, vector<1x8x8xf32>,
    %cst_30 = arith.constant dense<0.000000e+00> : vector<8x8xf32>
    %53 = tpu.matmul %49, %11, %cst_30 {dimension_numbers = #tpu.dot_dimension_numbers<[1], [0], [0], [1], [0, 0, 1, 1], [], []>} : vector<8x8xf32>, vector<8x8xf32>, vector<8x8xf32> -> vector<8x8xf32>
    %54 = arith.addf %32, %53 : vector<8x8xf32>
    %55 = vector.extract_strided_slice %7 {offsets = [0, 256], sizes = [8, 128], strides = [1, 1]} : vector<8x512xf32> to vector<8x128xf32>
    %56 = vector.extract_strided_slice %9 {offsets = [0, 256], sizes = [8, 128], strides = [1, 1]} : vector<8x512xf32> to vector<8x128xf32>
    %cst_31 = arith.constant dense<0.000000e+00> : vector<8x8xf32>
    %57 = tpu.matmul %55, %56, %cst_31 {dimension_numbers = #tpu.dot_dimension_numbers<[1], [1], [0], [0], [0, 0, 1, 0], [], []>} : vector<8x128xf32>, vector<8x128xf32>, vector<8x8xf32> -> vector<8x8xf32>
    %cst_32 = arith.constant dense<0xFF800000> : vector<8xf32>
    %58 = vector.multi_reduction <maximumf>, %57, %cst_32 [1] : vector<8x8xf32> to vector<8xf32>
    %59 = vector.shape_cast %58 : vector<8xf32> to vector<8x1xf32>
    %60 = vector.broadcast %59 : vector<8x1xf32> to vector<8x8xf32>
    %61 = arith.subf %57, %60 : vector<8x8xf32>
    %62 = math.exp %61 : vector<8x8xf32>
    %cst_33 = arith.constant dense<0.000000e+00> : vector<8xf32>
    %63 = vector.multi_reduction <add>, %62, %cst_33 [1] : vector<8x8xf32> to vector<8xf32>
    %64 = vector.shape_cast %63 : vector<8xf32> to vector<8x1xf32>
    %65 = tpu.reciprocal %64 {approx = true} : vector<8x1xf32> -> vector<8x1xf32>
    %66 = arith.mulf %64, %65 : vector<8x1xf32>
    %cst_34 = arith.constant 2.000000e+00 : f32
    %67 = vector.broadcast %cst_34 : f32 to vector<8x1xf32>
    %68 = arith.subf %67, %66 : vector<8x1xf32>
    %69 = arith.mulf %65, %68 : vector<8x1xf32>
    %70 = vector.broadcast %69 : vector<8x1xf32> to vector<8x8xf32>
    %71 = arith.mulf %62, %70 : vector<8x8xf32>
    %c0_35 = arith.constant 0 : index
    %c0_36 = arith.constant 0 : index
    %c16 = arith.constant 16 : index
    %72 = vector.load %arg10[%c0_35, %c0_36, %c16] : memref<1x8x32xf32, #tpu.memory_space<vmem>>, vector<1x8x8xf32>
    %73 = vector.shape_cast %72 : vector<1x8x8xf32> to vector<8x8xf32>
    %74 = vector.shape_cast %71 : vector<8x8xf32> to vector<1x8x8xf32>
    tpu.vector_store %arg10[%c0_35, %c0_36, %c16], %74 {strides = array<i32>} : memref<1x8x32xf32, #tpu.memory_space<vmem>>, vector<1x8x8xf32>,
    %cst_37 = arith.constant dense<0.000000e+00> : vector<8x8xf32>
    %75 = tpu.matmul %71, %11, %cst_37 {dimension_numbers = #tpu.dot_dimension_numbers<[1], [0], [0], [1], [0, 0, 1, 1], [], []>} : vector<8x8xf32>, vector<8x8xf32>, vector<8x8xf32> -> vector<8x8xf32>
    %76 = arith.addf %54, %75 : vector<8x8xf32>
    %77 = vector.extract_strided_slice %7 {offsets = [0, 384], sizes = [8, 128], strides = [1, 1]} : vector<8x512xf32> to vector<8x128xf32>
    %78 = vector.extract_strided_slice %9 {offsets = [0, 384], sizes = [8, 128], strides = [1, 1]} : vector<8x512xf32> to vector<8x128xf32>
    %cst_38 = arith.constant dense<0.000000e+00> : vector<8x8xf32>
    %79 = tpu.matmul %77, %78, %cst_38 {dimension_numbers = #tpu.dot_dimension_numbers<[1], [1], [0], [0], [0, 0, 1, 0], [], []>} : vector<8x128xf32>, vector<8x128xf32>, vector<8x8xf32> -> vector<8x8xf32>
    %cst_39 = arith.constant dense<0xFF800000> : vector<8xf32>
    %80 = vector.multi_reduction <maximumf>, %79, %cst_39 [1] : vector<8x8xf32> to vector<8xf32>
    %81 = vector.shape_cast %80 : vector<8xf32> to vector<8x1xf32>
    %82 = vector.broadcast %81 : vector<8x1xf32> to vector<8x8xf32>
    %83 = arith.subf %79, %82 : vector<8x8xf32>
    %84 = math.exp %83 : vector<8x8xf32>
    %cst_40 = arith.constant dense<0.000000e+00> : vector<8xf32>
    %85 = vector.multi_reduction <add>, %84, %cst_40 [1] : vector<8x8xf32> to vector<8xf32>
    %86 = vector.shape_cast %85 : vector<8xf32> to vector<8x1xf32>
    %87 = tpu.reciprocal %86 {approx = true} : vector<8x1xf32> -> vector<8x1xf32>
    %88 = arith.mulf %86, %87 : vector<8x1xf32>
    %cst_41 = arith.constant 2.000000e+00 : f32
    %89 = vector.broadcast %cst_41 : f32 to vector<8x1xf32>
    %90 = arith.subf %89, %88 : vector<8x1xf32>
    %91 = arith.mulf %87, %90 : vector<8x1xf32>
    %92 = vector.broadcast %91 : vector<8x1xf32> to vector<8x8xf32>
    %93 = arith.mulf %84, %92 : vector<8x8xf32>
    %c0_42 = arith.constant 0 : index
    %c0_43 = arith.constant 0 : index
    %c24 = arith.constant 24 : index
    %94 = vector.load %arg10[%c0_42, %c0_43, %c24] : memref<1x8x32xf32, #tpu.memory_space<vmem>>, vector<1x8x8xf32>
    %95 = vector.shape_cast %94 : vector<1x8x8xf32> to vector<8x8xf32>
    %96 = vector.shape_cast %93 : vector<8x8xf32> to vector<1x8x8xf32>
    tpu.vector_store %arg10[%c0_42, %c0_43, %c24], %96 {strides = array<i32>} : memref<1x8x32xf32, #tpu.memory_space<vmem>>, vector<1x8x8xf32>,
    %cst_44 = arith.constant dense<0.000000e+00> : vector<8x8xf32>
    %97 = tpu.matmul %93, %11, %cst_44 {dimension_numbers = #tpu.dot_dimension_numbers<[1], [0], [0], [1], [0, 0, 1, 1], [], []>} : vector<8x8xf32>, vector<8x8xf32>, vector<8x8xf32> -> vector<8x8xf32>
    %98 = arith.addf %76, %97 : vector<8x8xf32>
    %c0_45 = arith.constant 0 : index
    %c0_46 = arith.constant 0 : index
    %99 = vector.load %arg8[%c0_45, %c0_46] : memref<8x32xf32, #tpu.memory_space<vmem>>, vector<8x32xf32>
    %cst_47 = arith.constant dense<0.000000e+00> : vector<8x32xf32>
    %100 = tpu.matmul %98, %99, %cst_47 {dimension_numbers = #tpu.dot_dimension_numbers<[1], [0], [0], [1], [0, 0, 1, 1], [], []>} : vector<8x8xf32>, vector<8x32xf32>, vector<8x32xf32> -> vector<8x32xf32>
    %c0_48 = arith.constant 0 : index
    %c0_49 = arith.constant 0 : index
    %c0_50 = arith.constant 0 : index
    %101 = vector.load %arg9[%c0_48, %c0_49, %c0_50] : memref<1x8x32xf32, #tpu.memory_space<vmem>>, vector<1x8x32xf32>
    %102 = vector.shape_cast %101 : vector<1x8x32xf32> to vector<8x32xf32>
    %103 = vector.shape_cast %100 : vector<8x32xf32> to vector<1x8x32xf32>
    tpu.vector_store %arg9[%c0_48, %c0_49, %c0_50], %103 {strides = array<i32>} : memref<1x8x32xf32, #tpu.memory_space<vmem>>, vector<1x8x32xf32>,
    return
  }
  func.func @transform_0(%arg0: i32, %arg1: i32) -> (i32, i32, i32) {
    %c0_i32 = arith.constant 0 : i32
    %c0_i32_0 = arith.constant 0 : i32
    return %arg0, %arg1, %c0_i32 : i32, i32, i32
  }
  func.func @transform_1(%arg0: i32, %arg1: i32) -> (i32, i32, i32) {
    %c0_i32 = arith.constant 0 : i32
    %c0_i32_0 = arith.constant 0 : i32
    %c0_i32_1 = arith.constant 0 : i32
    return %arg0, %c0_i32, %c0_i32_0 : i32, i32, i32
  }
  func.func @transform_2(%arg0: i32, %arg1: i32) -> (i32, i32, i32) {
    %c0_i32 = arith.constant 0 : i32
    %c0_i32_0 = arith.constant 0 : i32
    %c0_i32_1 = arith.constant 0 : i32
    return %arg0, %c0_i32, %c0_i32_0 : i32, i32, i32
  }
  func.func @transform_3(%arg0: i32, %arg1: i32) -> (i32, i32) {
    %c0_i32 = arith.constant 0 : i32
    %c0_i32_0 = arith.constant 0 : i32
    %c0_i32_1 = arith.constant 0 : i32
    return %c0_i32, %c0_i32_0 : i32, i32
  }
  func.func @transform_4(%arg0: i32, %arg1: i32) -> (i32, i32) {
    %c0_i32 = arith.constant 0 : i32
    %c0_i32_0 = arith.constant 0 : i32
    %c0_i32_1 = arith.constant 0 : i32
    return %c0_i32, %c0_i32_0 : i32, i32
  }
  func.func @transform_5(%arg0: i32, %arg1: i32) -> (i32, i32) {
    %c0_i32 = arith.constant 0 : i32
    %c0_i32_0 = arith.constant 0 : i32
    %c0_i32_1 = arith.constant 0 : i32
    return %c0_i32, %c0_i32_0 : i32, i32
  }
  func.func @transform_6(%arg0: i32, %arg1: i32) -> (i32, i32) {
    %c0_i32 = arith.constant 0 : i32
    %c0_i32_0 = arith.constant 0 : i32
    %c0_i32_1 = arith.constant 0 : i32
    return %c0_i32, %c0_i32_0 : i32, i32
  }
  func.func @transform_7(%arg0: i32, %arg1: i32) -> (i32, i32, i32) {
    %c0_i32 = arith.constant 0 : i32
    %c0_i32_0 = arith.constant 0 : i32
    return %arg0, %arg1, %c0_i32 : i32, i32, i32
  }
  func.func @transform_8(%arg0: i32, %arg1: i32) -> (i32, i32, i32) {
    %c0_i32 = arith.constant 0 : i32
    %c0_i32_0 = arith.constant 0 : i32
    return %arg0, %arg1, %c0_i32 : i32, i32, i32
  }
}

</mosaic_0001>

<bundles_post_ra>
// kernel: tpu_custom_call.1
= control target key start
LH: loop header
LB: loop body
LE: loop exit
PB: predicated region body
PF: predicated region fallthrough
CT: control target
= control target key end

     0   :  { %s1768_s0 = inlined_call_operand.vmem [shape: f32[2,8,32], index: 0, kind: input, shape index: {}]   ;;  %s1769_s1 = inlined_call_operand.vmem [shape: f32[2,8,32], index: 1, kind: input, shape index: {}]   ;;  %s1770_s2 = inlined_call_operand.hbm [shape: f32[2,8,32], index: 2, kind: input, shape index: {}]   ;;  %s1771_s3 = inlined_call_operand.hbm [shape: f32[32,512], index: 3, kind: input, shape index: {}]   ;;  %s1772_s4 = inlined_call_operand.hbm [shape: f32[32,512], index: 4, kind: input, shape index: {}]   ;;  %s1773_s5 = inlined_call_operand.vmem [shape: f32[32,8], index: 5, kind: input, shape index: {}]   ;;  %s1774_s6 = inlined_call_operand.vmem [shape: f32[8,32], index: 6, kind: input, shape index: {}]   ;;  %s1775_s7 = inlined_call_operand.hbm [shape: f32[2,8,32], index: 7, kind: output, shape index: {0}]   ;;  %s1776_s8 = inlined_call_operand.hbm [shape: f32[2,8,32], index: 8, kind: output, shape index: {1}]  }
   0x1   :  { %1778 = sst [smem:[#allocation16_spill]] %s1768_s0 }
   0x2   :  { %1779 = sst [smem:[#allocation17_spill]] %s1771_s3 }
   0x3   :  { %1780 = sst [smem:[#allocation18_spill]] %s1772_s4 }
   0x4   :  { %14 = vsyncpa [#allocation3], 0 }
   0x5   :  { %16 = vsyncpa [#allocation3 + $0x1], 0 }
   0x6   :  { %17 = vsyncpa [#allocation6], 0 }
   0x7   :  { %18 = vsyncpa [#allocation4], 0 }
   0x8   :  { %20 = vsyncpa [#allocation4 + $0x1], 0 }
   0x9   :  { %21 = vsyncpa [#allocation10], 0 }
   0xa   :  { %23 = vsyncpa [#allocation10 + $0x1], 0  ;;  %s1532_s27 = smov 0   ;;  %s1534_s28 = smov 0  }
   0xb   :  { %s1536_s29 = smov 0   ;;  %s1538_s30 = smov 0  }
   0xc   :  { %s1540_s9 = smov 0   ;;  %s1542_s10 = smov 0  }
   0xd LB: > { %s1125_s11 = sadd.s32 4294967295, %s1478_s10   ;;  %p1127_p0 = scmp.ge.s32.totalorder %s1478_s10, 1  ;;  %s1478_s10 = sphi %s1542_s10, %s29_s10   ;;  %s1474_s9 = sphi %s1540_s9, %s1795_s9   ;;  %s1470_s30 = sphi %s1538_s30, %s1794_s30   ;;  %s1466_s29 = sphi %s1536_s29, %s1793_s29   ;;  %s1462_s28 = sphi %s1534_s28, %s1792_s28   ;;  %s1458_s27 = sphi %s1532_s27, %s1791_s27  }
   0xe   : > { %p1566_p1 = scmp.eq.s32.totalorder %s1125_s11, 0  ;;  %p266_p2 = scmp.lt.s32.totalorder %s1478_s10, 3 }
   0xf   : > { %s1782_s3 = sld [smem:[#allocation17_spill]]  ;;  %s1480_s17 = smov [#allocation5]  }
  0x10   : > { %p1574_p3 = pnand %p1127_p0, %p266_p2  ;;  %s279_s18 = sshll.u32 %s1480_s17, 4  ;;  %s280_s18 = int_to_ptr.vmem [resolvable:$true] %s279_s18 }
  0x11   : > { %p1130_p6 = scmp.ge.s32.totalorder %s1478_s10, 2  ;;  %s1784_s4 = sld [smem:[#allocation18_spill]] }
  0x12   : > { %p1175_p4 = pneg %p1574_p3  ;;  %s1481_s22 = smov 512  }
  0x13   : > { %s1482_s23 = smov 32   ;;  %s1483_s24 = smov [#allocation7]  }
  0x14   : > { %p1176_p5 = pnand %p1175_p4, %p1566_p1  ;;  %s293_s25 = sshll.u32 %s1483_s24, 4  ;;  %s294_s25 = int_to_ptr.vmem [resolvable:$true] %s293_s25 }
  0x15   : > { %s277_s15 = sshll.u32 %s1782_s3, 4  ;;  %s41_s26 = sadd.s32 1, %s1474_s9  ;;  %s278_s15 = int_to_ptr.hbm [resolvable:$true] %s277_s15 }
  0x16   : > { %1178 = dma.hbm_to_vmem [thread:$0]  (!%p1176_p5), %s278_s15, 2048, %s280_s18, [#allocation6], %s1481_s22, %s1481_s22, %s1482_s23  }
  0x17   : > { %s291_s21 = sshll.u32 %s1784_s4, 4  ;;  %s1126_s13 = sadd.s32 4294967294, %s1478_s10   ;;  %s292_s21 = int_to_ptr.hbm [resolvable:$true] %s291_s21 }
  0x18   : > { %1181 = dma.hbm_to_vmem [thread:$0]  (!%p1176_p5), %s292_s21, 2048, %s294_s25, [#allocation6], %s1481_s22, %s1481_s22, %s1482_s23  }
  0x19   : > { %p43_p7 = scmp.ge.s32.totalorder %s41_s26, 2  ;;  %s102_s14 = sadd.s32 1, %s1466_s29 }
  0x1a   : > { %p109_p8 = scmp.ne.s32.totalorder %s1466_s29, %s1462_s28  ;;  %p110_p9 = scmp.eq.s32.totalorder %s1478_s10, 0 }
  0x1b   : > { %s1797_s26 = smov (%p43_p7, %s41_s26), 0  ;;  %p115_p10 = scmp.ne.s32.totalorder %s1462_s28, %s1458_s27 }
  0x1c   : > { %1785 = sst [smem:[#allocation15_spill]] %s1797_s26  ;;  %s99_s15 = ssub.s32 %s1474_s9, %s1797_s26 }
  0x1d   : > { %p225_p11 = scmp.eq.s32.totalorder %s1125_s11, 1  ;;  %p100_p12 = scmp.eq.s32.totalorder %s99_s15, 0 }
  0x1e   : > { %p1602_p13 = por %p1566_p1, %p115_p10  ;;  %p231_p2 = scmp.eq.s32.totalorder %s1126_s13, 1 }
  0x1f   : > { %p1606_p0 = por %p225_p11, %p109_p8  ;;  %p111_p4 = por %p110_p9, %p109_p8 }
  0x20   : > { %s1611_s19 = scalar_select %p100_p12, %s1466_s29, %s102_s14  }
  0x21   : > { %p1613_p5 = por %p231_p2, %p115_p10  ;;  %s330_s21 = sand.u32 1, %s1466_s29  }
  0x22   : > { %s1132_s11 = sshll.u32 %s1474_s9, 3  ;;  %p1195_p7 = scmp.lt.s32.totalorder %s1478_s10, 2 }
  0x23   : > { %s1131_s22 = sshll.u32 %s330_s21, 3  ;;  %s338_s25 = scalar_lea.hbm %s1770_s2, %s1132_s11 }
  0x24   : > { %s340_s15 = sshll.u32 %s338_s25, 4  ;;  %s334_s3 = scalar_lea.vmem [#allocation2], %s1131_s22  ;;  %s341_s15 = int_to_ptr.hbm [resolvable:$true] %s340_s15 }
  0x25   : > { %s342_s4 = sshll.u32 %s334_s3, 4  ;;  %p1183_p11 = pnand %p1195_p7, %p111_p4  ;;  %s343_s4 = int_to_ptr.vmem [resolvable:$true] %s342_s4 }
  0x26   : > { %s331_s13 = scalar_lea.sflag [#allocation3], %s330_s21  ;;  %351 = sbr.rel (%p1574_p3) target bundleno = 1242 (0x4da), region = 48 }
  0x27   : > { %1185 = dma.hbm_to_vmem [thread:$0]  (!%p1183_p11), %s341_s15, 128, %s343_s4, %s331_s13  }
  0x28   : > { %s1626_s14 = sand.u32 (!%p1574_p3), 1, %s1462_s28  }
  0x29   : > { %s1629_s26 = sshll.u32 (!%p1574_p3), %s1626_s14, 3  ;;  %s354_s11 = scalar_lea.sflag (!%p1574_p3), [#allocation3], %s1626_s14 }
  0x2a   : > { %s357_s22 = scalar_lea.vmem (!%p1574_p3), [#allocation2], %s1629_s26 }
  0x2b   : > { %1441 = dma.done.wait (%p1602_p13), %s354_s11, 128  }
  0x2c   : > { %1443 = vsyncadd (%p1602_p13), %s354_s11, 4294967168 }
  0x2d   : > { %1445 = dma.done.wait (%p1566_p1), [#allocation6], 4096  }
  0x2e   : > { %1447 = vsyncadd (%p1566_p1), [#allocation6], 4294963200  ;;  %p417_p3 = scmp.lt.s32.totalorder %s1470_s30, 1  ;;  %v443_v0 = vld [vmem:[#allocation5 + $0x60] sm:$0xff]  ;;  %v444_v1 = vld [vmem:[#allocation5 + $0x68] sm:$0xff]  ;;  %s1789_s0 = sld [smem:[#allocation16_spill]] }
  0x2f   : > { %v439_v2 = vld [vmem:[#allocation5 + $0x40] sm:$0xff]  ;;  %463 = vmatpush.msra.mxu0 %v443_v0  ;;  %483 = vmatpush.msra.mxu1 %v444_v1  ;;  %v440_v3 = vld [vmem:[#allocation5 + $0x48] sm:$0xff]  ;;  %v445_v4 = vld [vmem:[#allocation5 + $0x70] sm:$0xff]  ;;  %vm447_vm0 = vcmask 261120   ;;  %vm677_vm1 = vcmask 64512   ;;  %vm731_vm2 = vcmask 130112  }
  0x30   : > { %s1643_s3 = scalar_select %p417_p3, %s1470_s30, 1  ;;  %503 = vmatpush.msra.mxu2 %v445_v4  ;;  %v435_v5 = vld [vmem:[#allocation5 + $0x20] sm:$0xff]  ;;  %v436_v6 = vld [vmem:[#allocation5 + $0x28] sm:$0xff]  ;;  %v441_v7 = vld [vmem:[#allocation5 + $0x50] sm:$0xff]  ;;  %vm816_vm3 = vcmask 195712   ;;  %vm879_vm4 = vcmask 261312  }
  0x31   : > { %464 = vmatpush.msra.mxu0 %v439_v2  ;;  %484 = vmatpush.msra.mxu1 %v440_v3  ;;  %v437_v8 = vld [vmem:[#allocation5 + $0x30] sm:$0xff]  ;;  %v431_v9 = vld [vmem:[#allocation5] sm:$0xff]  ;;  %v432_v10 = vld [vmem:[#allocation5 + $0x8] sm:$0xff]  ;;  %s1700_s21 = scalar_lea.vmem [#allocation9], %s1629_s26  ;;  %s1486_s23 = smov 24  }
  0x32   : > { %s1139_s4 = sshll.u32 %s1643_s3, 3  ;;  %504 = vmatpush.msra.mxu2 %v441_v7  ;;  %v433_v12 = vld [vmem:[#allocation5 + $0x10] sm:$0xff]  ;;  %v543_v13 = vld [vmem:[#allocation7 + $0x60] sm:$0xff]  ;;  %v544_v14 = vld [vmem:[#allocation7 + $0x68] sm:$0xff]  ;;  %s1157_s15 = sshll.u32 %s1470_s30, 3 }
  0x33   : > { %465 = vmatpush.msra.mxu0 %v435_v5  ;;  %485 = vmatpush.msra.mxu1 %v436_v6  ;;  %v539_v15 = vld [vmem:[#allocation7 + $0x40] sm:$0xff]  ;;  %v545_v16 = vld [vmem:[#allocation7 + $0x70] sm:$0xff]  ;;  %v540_v17 = vld [vmem:[#allocation7 + $0x48] sm:$0xff]  ;;  %s427_s24 = scalar_lea.vmem %s1769_s1, %s1139_s4  ;;  %s961_s3 = scalar_lea.hbm %s1776_s8, %s1157_s15 }
  0x34   : > { %s423_s17 = scalar_lea.vmem %s1789_s0, %s1139_s4  ;;  %505 = vmatpush.msra.mxu2 %v437_v8  ;;  %v535_v18 = vld [vmem:[#allocation7 + $0x20] sm:$0xff]  ;;  %v541_v19 = vld [vmem:[#allocation7 + $0x50] sm:$0xff]  ;;  %v536_v20 = vld [vmem:[#allocation7 + $0x28] sm:$0xff]  ;;  %s963_s4 = sshll.u32 %s1700_s21, 4  ;;  %s964_s4 = int_to_ptr.vmem [resolvable:$true] %s963_s4 }
  0x35   : > { %v1651_v11 = vld [vmem:[%s423_s17] sm:$0xff]  ;;  %466 = vmatpush.msra.mxu0 %v431_v9  ;;  %486 = vmatpush.msra.mxu1 %v432_v10  ;;  %v531_v21 = vld [vmem:[#allocation7] sm:$0xff]  ;;  %v532_v23 = vld [vmem:[#allocation7 + $0x8] sm:$0xff]  ;;  %s1485_s17 = smov 8   ;;  %s965_s12 = sshll.u32 %s961_s3, 4  ;;  %s966_s12 = int_to_ptr.hbm [resolvable:$true] %s965_s12 }
  0x36   : > { %1141 = vmatmul.msk.f32.vlgmr.msra.gmra.mxu0 %vm447_vm0, %v1651_v11  ;;  %1142 = vmatmul.msk.f32.vlgmr.msra.gmra.mxu1 %vm447_vm0, %v1651_v11  ;;  %v537_v22 = vld [vmem:[#allocation7 + $0x30] sm:$0xff]  ;;  %v446_v38 = vld [vmem:[#allocation5 + $0x78] sm:$0xff]  ;;  %v633_v41 = vld [vmem:[%s1773_s5 + $0x18] sm:$0xff]  ;;  %s935_s16 = scalar_lea.sflag [#allocation10], %s1626_s14 }
  0x37   : > { %506 = vmatpush.msra.mxu2 %v433_v12  ;;  %562 = vmatpush.msrb.mxu0 %v543_v13  ;;  %v429_v24 = vld [vmem:[%s427_s24] sm:$0xff]  ;;  %v442_v39 = vld [vmem:[#allocation5 + $0x58] sm:$0xff]  ;;  %v632_v43 = vld [vmem:[%s1773_s5 + $0x10] sm:$0xff]  ;;  %s1380_s24 = scalar_lea.hbm %s1776_s8, 16 }
  0x38   : > { %582 = vmatpush.msrb.mxu1 %v544_v14  ;;  %1143 = vmatmul.msk.f32.vlgmr.msra.gmra.mxu2 %vm447_vm0, %v1651_v11  ;;  %v533_v25 = vld [vmem:[#allocation7 + $0x10] sm:$0xff]  ;;  %v438_v40 = vld [vmem:[#allocation5 + $0x38] sm:$0xff] }
  0x39   : > { %563 = vmatpush.msrb.mxu0 %v539_v15  ;;  %602 = vmatpush.msrb.mxu2 %v545_v16  ;;  %v434_v42 = vld [vmem:[#allocation5 + $0x18] sm:$0xff]  ;;  %v630_v47 = vld [vmem:[%s1773_s5] sm:$0xff] }
  0x3a   : > { %583 = vmatpush.msrb.mxu1 %v540_v17  ;;  %523 = vmatpush.msra.mxu3 %v446_v38  ;;  %v546_v44 = vld [vmem:[#allocation7 + $0x78] sm:$0xff] }
  0x3b   : > { %564 = vmatpush.msrb.mxu0 %v535_v18  ;;  %603 = vmatpush.msrb.mxu2 %v541_v19  ;;  %v631_v45 = vld [vmem:[%s1773_s5 + $0x8] sm:$0xff] }
  0x3c   : > { %584 = vmatpush.msrb.mxu1 %v536_v20  ;;  %524 = vmatpush.msra.mxu3 %v442_v39  ;;  %v542_v46 = vld [vmem:[#allocation7 + $0x58] sm:$0xff]  ;;  %v904_v39 = vld [vmem:[%s1774_s6] sm:$0xff] }
  0x3d   : > { %565 = vmatpush.msrb.mxu0 %v531_v21  ;;  %604 = vmatpush.msrb.mxu2 %v537_v22  ;;  %v538_v48 = vld [vmem:[#allocation7 + $0x38] sm:$0xff] }
  0x3e   : > { %585 = vmatpush.msrb.mxu1 %v532_v23  ;;  %1145 = vmatmul.msk.f32.vlgmr.msrb.gmra.mxu0 %vm447_vm0, %v429_v24  ;;  %v430_v49 = vld [vmem:[%s357_s22] sm:$0xff]  ;;  %s1484_s22 = smov 16  }
  0x3f   : > { %1146 = vmatmul.msk.f32.vlgmr.msrb.gmra.mxu1 %vm447_vm0, %v429_v24  ;;  %605 = vmatpush.msrb.mxu2 %v533_v25  ;;  %v534_v50 = vld [vmem:[#allocation7 + $0x18] sm:$0xff] }
  0x40   : > { %1147 = vmatmul.msk.f32.vlgmr.msrb.gmra.mxu2 %vm447_vm0, %v429_v24  ;;  %525 = vmatpush.msra.mxu3 %v438_v40 }
  0x41   : > { %649 = vmatpush.msra.mxu0 %v633_v41 }
  0x42   : > { %526 = vmatpush.msra.mxu3 %v434_v42 }
  0x43   : > { %1144 = vmatmul.msk.f32.vlgmr.msra.gmra.mxu3 %vm447_vm0, %v1651_v11  ;;  %650 = vmatpush.msra.mxu0 %v632_v43 }
  0x44   : > { %622 = vmatpush.msrb.mxu3 %v546_v44 }
  0x45   : > { %651 = vmatpush.msra.mxu0 %v631_v45 }
  0x46   : > { %623 = vmatpush.msrb.mxu3 %v542_v46 }
  0x47   : > { %652 = vmatpush.msra.mxu0 %v630_v47 }
  0x48   : > { %624 = vmatpush.msrb.mxu3 %v538_v48  ;;  %1149 = vmatmul.msk.f32.vlgmr.msra.gmra.mxu0 %vm447_vm0, %v430_v49 }
  0x4a   : > { %625 = vmatpush.msrb.mxu3 %v534_v50 }
  0x4b   : > { %1148 = vmatmul.msk.f32.vlgmr.msrb.gmra.mxu3 %vm447_vm0, %v429_v24 }
  0xb3   : > { %v468_v26 = vpop.f32.mrf.mxu0  ;;  %v488_v27 = vpop.f32.mrf.mxu1 }
  0xbb   : > { %v508_v28 = vpop.f32.mrf.mxu2  ;;  %v567_v29 = vpop.f32.mrf.mxu0 }
  0xbc   : > { %v587_v30 = vpop.f32.mrf.mxu1  ;;  %672 = vmatpush.xpose.msra.mxu1 %v567_v29 }
  0xbd   : > { %708 = vmatpush.xpose.msra.mxu2 %v587_v30 }
  0xbf   : > { %673 = vmatmul.f32.vlgmr.msra.gmra.mxu1 %v468_v26 }
  0xc0   : > { %709 = vmatmul.f32.vlgmr.msra.gmra.mxu2 %v488_v27 }
  0xc3   : > { %v607_v31 = vpop.f32.mrf.mxu2 }
  0xc4   : > { %793 = vmatpush.xpose.msrb.mxu1 %v607_v31 }
  0xc5   : > { %v654_v63 = vpop.f32.mrf.mxu0 }
  0xc6   : > { %v528_v62 = vpop.f32.mrf.mxu3  ;;  %773 = vmatpush.msrb.mxu0 %v654_v63  ;;  %750 = vmatpush.msra.mxu3 %v654_v63 }
  0xc7   : > { %794 = vmatmul.f32.vlgmr.msrb.gmra.mxu1 %v508_v28  ;;  %835 = vmatpush.msrb.mxu2 %v654_v63 }
  0xc8   : > { %898 = vmatpush.msra.mxu0 %v654_v63  ;;  %923 = vmatpush.msra.mxu1 %v904_v39 }
  0xce   : > { %v627_v0 = vpop.f32.mrf.mxu3 }
  0xcf   : > { %856 = vmatpush.xpose.msrb.mxu3 %v627_v0 }
 0x13c   : > { %v1667_v32 = vpop.f32.mrf.mxu1 }
 0x13d   : > { %v678_v33 = vsel %vm677_vm1, %v1667_v32, -inf }
 0x13e   : > { %679 = vmax.xlane.f32.xlu1 %v678_v33 }
 0x143   : > { %v710_v34 = vpop.f32.mrf.mxu2 }
 0x144   : > { %v713_v35 = vsel %vm677_vm1, %v710_v34, -inf  ;;  %v795_v36 = vpop.f32.mrf.mxu1 }
 0x145   : > { %714 = vmax.xlane.f32.xlu0 %v713_v35  ;;  %v798_v37 = vsel %vm677_vm1, %v795_v36, -inf }
 0x146   : > { %799 = vmax.xlane.f32.xlu1 %v798_v37 }
 0x1b1   : > { %v680_v51 = vpop.xlane.xlu1 %679 }
 0x1b2   : > { %v681_v14 = vsub.f32 %v1667_v32, %v680_v51 }
 0x1b4   : > { %v682_v15 = vmul.f32 1.442695, %v681_v14 }
 0x1b8   : > { %v715_v52 = vpop.xlane.xlu0 %714 }
 0x1b9   : > { %v716_v53 = vsub.f32 %v710_v34, %v715_v52  ;;  %v800_v54 = vpop.xlane.xlu1 %799 }
 0x1ba   : > { %v801_v56 = vsub.f32 %v795_v36, %v800_v54 }
 0x1bb   : > { %v717_v55 = vmul.f32 1.442695, %v716_v53 }
 0x1bc   : > { %v802_v57 = vmul.f32 1.442695, %v801_v56 }
 0x1bd   : > { %1254 = vpow2.f32 %v717_v55 }
 0x1be   : > { %1256 = vpow2.f32 %v802_v57 }
 0x1c3   : > { %v1255_v58 = vpop.eup %1254 }
 0x1c4   : > { %v719_v59 = vsel %vm677_vm1, %v1255_v58, 0.0  ;;  %v1257_v60 = vpop.eup %1256 }
 0x1c5   : > { %720 = vadd.xlane.f32.xlu0 %v719_v59  ;;  %v804_v61 = vsel %vm677_vm1, %v1257_v60, 0.0 }
 0x1cd   : > { %805 = vadd.xlane.f32.xlu0 %v804_v61 }
 0x238   : > { %v721_v1 = vpop.xlane.xlu0 %720 }
 0x239   : > { %1258 = vrcp.f32 %v721_v1 }
 0x23f   : > { %v1259_v2 = vpop.eup %1258 }
 0x240   : > { %v723_v3 = vmul.f32 %v1259_v2, %v721_v1  ;;  %v806_v4 = vpop.xlane.xlu0 %805 }
 0x241   : > { %1260 = vrcp.f32 %v806_v4 }
 0x242   : > { %v724_v5 = vsub.f32 2.0, %v723_v3  ;;  %1262 = vpow2.f32 %v682_v15 }
 0x244   : > { %v725_v6 = vmul.f32 %v1259_v2, %v724_v5 }
 0x246   : > { %v726_v7 = vmul.f32 %v1255_v58, %v725_v6 }
 0x247   : > { %v1261_v8 = vpop.eup %1260 }
 0x248   : > { %v808_v9 = vmul.f32 %v1261_v8, %v806_v4  ;;  %1150 = vmatmul.msk.f32.vlgmr.msra.gmra.mxu3 %vm677_vm1, %v726_v7  ;;  %v1263_v18 = vpop.eup %1262 }
 0x249   : > { %v684_v19 = vsel %vm677_vm1, %v1263_v18, 0.0 }
 0x24a   : > { %v809_v10 = vsub.f32 2.0, %v808_v9 }
 0x24c   : > { %v810_v11 = vmul.f32 %v1261_v8, %v809_v10 }
 0x24e   : > { %v811_v12 = vmul.f32 %v1257_v60, %v810_v11 }
 0x250   : > { %813 = vrot.lane.b32.xlu0 %v811_v12, %s1484_s22  ;;  %1152 = vmatmul.msk.f32.vlgmr.msrb.gmra.mxu2 %vm677_vm1, %v811_v12  ;;  %s1374_s22 = sshra.s32 %s966_s12, 4  ;;  %s1375_s22 = int_to_ptr.hbm [resolvable:$true] %s1374_s22 }
 0x251   : > { %857 = vmatmul.f32.vlgmr.msrb.gmra.mxu3 %v528_v62  ;;  %p1381_p10 = scmp.lt.s32.totalorder %s1375_s22, %s1776_s8 }
 0x2c2   : > { %v814_v32 = vpop.permute.xlu0 %813 }
 0x2cb   : > { %v752_v13 = vpop.f32.mrf.mxu3 }
 0x2d3   : > { %v837_v43 = vpop.f32.mrf.mxu2 }
 0x2d4   : > { %v858_v16 = vpop.f32.mrf.mxu3 }
 0x2d5   : > { %v861_v17 = vsel %vm677_vm1, %v858_v16, -inf }
 0x2d6   : > { %862 = vmax.xlane.f32.xlu2 %v861_v17 }
 0x2de   : > { %685 = vadd.xlane.f32.xlu2 %v684_v19 }
 0x2f6   : > { %728 = vrot.lane.b32.xlu2 %v726_v7, %s1485_s17  ;;  %s1376_s17 = scalar_lea.hbm %s1375_s22, 8 }
 0x2f7   : > { %p1377_p1 = scmp.ne.s32.totalorder %s1375_s22, %s1376_s17  ;;  %p1382_p12 = scmp.lt.s32.totalorder %s1380_s24, %s1376_s17 }
 0x2f9   : > { %p1378_p8 = pnand %p1377_p1, %p1606_p0  ;;  %p1383_p13 = por %p1382_p12, %p1381_p10 }
 0x2fb   : > { %p1379_p9 = pneg %p1378_p8 }
 0x2fd   : > { %p1384_p2 = pnand %p1383_p13, %p1379_p9 }
 0x349   : > { %v863_v20 = vpop.xlane.xlu2 %862 }
 0x34a   : > { %v864_v21 = vsub.f32 %v858_v16, %v863_v20 }
 0x34c   : > { %v865_v22 = vmul.f32 1.442695, %v864_v21 }
 0x34e   : > { %1264 = vpow2.f32 %v865_v22 }
 0x351   : > { %v686_v23 = vpop.xlane.xlu2 %685 }
 0x352   : > { %1266 = vrcp.f32 %v686_v23 }
 0x354   : > { %v1265_v24 = vpop.eup %1264 }
 0x355   : > { %v867_v25 = vsel %vm677_vm1, %v1265_v24, 0.0 }
 0x356   : > { %868 = vadd.xlane.f32.xlu1 %v867_v25 }
 0x358   : > { %v1267_v26 = vpop.eup %1266 }
 0x359   : > { %v688_v27 = vmul.f32 %v1267_v26, %v686_v23  ;;  %v729_v31 = vpop.permute.xlu2 %728 }
 0x35b   : > { %v689_v28 = vsub.f32 2.0, %v688_v27 }
 0x35d   : > { %v690_v29 = vmul.f32 %v1267_v26, %v689_v28 }
 0x35f   : > { %v691_v30 = vmul.f32 %v1263_v18, %v690_v29 }
 0x361   : > { %692 = vst.msk [vmem:[%s1700_s21] sm:$0xff] %vm677_vm1, %v691_v30  ;;  %1151 = vmatmul.msk.f32.vlgmr.msrb.gmra.mxu0 %vm677_vm1, %v691_v30 }
 0x362   : > { %732 = vst.msk [vmem:[%s1700_s21] sm:$0xff] %vm731_vm2, %v729_v31 }
 0x363   : > { %817 = vst.msk [vmem:[%s1700_s21] sm:$0xff] %vm816_vm3, %v814_v32 }
 0x3c9   : > { %v869_v33 = vpop.xlane.xlu1 %868 }
 0x3ca   : > { %1268 = vrcp.f32 %v869_v33 }
 0x3d0   : > { %v1269_v34 = vpop.eup %1268 }
 0x3d1   : > { %v871_v35 = vmul.f32 %v1269_v34, %v869_v33 }
 0x3d3   : > { %v872_v36 = vsub.f32 2.0, %v871_v35 }
 0x3d5   : > { %v873_v37 = vmul.f32 %v1269_v34, %v872_v36 }
 0x3d7   : > { %v874_v38 = vmul.f32 %v1265_v24, %v873_v37 }
 0x3d9   : > { %876 = vrot.lane.b32.xlu1 %v874_v38, %s1486_s23  ;;  %1153 = vmatmul.msk.f32.vlgmr.msra.gmra.mxu0 %vm677_vm1, %v874_v38 }
 0x3de   : > { %v775_v41 = vpop.f32.mrf.mxu0 }
 0x3df   : > { %v776_v42 = vadd.f32 %v775_v41, %v752_v13 }
 0x3e1   : > { %v840_v44 = vadd.f32 %v837_v43, %v776_v42 }
 0x44b   : > { %v877_v40 = vpop.permute.xlu1 %876 }
 0x44c   : > { %880 = vst.msk [vmem:[%s1700_s21] sm:$0xff] %vm879_vm4, %v877_v40 }
 0x456   : > { %v900_v45 = vpop.f32.mrf.mxu0 }
 0x457   : > { %v903_v46 = vadd.f32 %v900_v45, %v840_v44 }
 0x459   : > { %1154 = vmatmul.msk.f32.vlgmr.msra.gmra.mxu1 %vm677_vm1, %v903_v46 }
 0x45a   : > { %1387 = shalt.err (!%p1384_p2)
}
 0x45b   : > { %1172 = dma.vmem_to_hbm [thread:$0]  (%p1606_p0), %s964_s4, 128, %s966_s12, %s935_s16  }
 0x45c   : > { %s946_s3 = scalar_lea.hbm %s1775_s7, %s1157_s15  ;;  %s409_s30 = scalar_lea.vmem [#allocation8], %s1629_s26 }
 0x45d   : > { %s948_s23 = sshll.u32 %s409_s30, 4  ;;  %s950_s0 = sshll.u32 %s946_s3, 4  ;;  %s949_s23 = int_to_ptr.vmem [resolvable:$true] %s948_s23  ;;  %s951_s0 = int_to_ptr.hbm [resolvable:$true] %s950_s0 }
 0x45e   : > { %s930_s22 = scalar_lea.sflag [#allocation4], %s1626_s14  ;;  %s1402_s17 = sshra.s32 %s951_s0, 4  ;;  %s1403_s17 = int_to_ptr.hbm [resolvable:$true] %s1402_s17 }
 0x45f   : > { %s1404_s24 = scalar_lea.hbm %s1403_s17, 8  ;;  %s1408_s15 = scalar_lea.hbm %s1775_s7, 16 }
 0x460   : > { %p1405_p4 = scmp.ne.s32.totalorder %s1403_s17, %s1404_s24  ;;  %p1409_p3 = scmp.lt.s32.totalorder %s1403_s17, %s1775_s7 }
 0x461   : > { %p1410_p1 = scmp.lt.s32.totalorder %s1408_s15, %s1404_s24 }
 0x462   : > { %p1406_p7 = pnand %p1405_p4, %p1606_p0 }
 0x463   : > { %p1411_p8 = por %p1410_p1, %p1409_p3 }
 0x464   : > { %p1407_p11 = pneg %p1406_p7 }
 0x466   : > { %p1412_p9 = pnand %p1411_p8, %p1407_p11 }
 0x4d6   : > { %v925_v47 = vpop.f32.mrf.mxu1 }
 0x4d7   : > { %928 = vst.msk [vmem:[%s409_s30] sm:$0xff] %vm447_vm0, %v925_v47 }
 0x4d8   : > { %1415 = shalt.err (!%p1412_p9)
}
 0x4d9   : > { %1171 = dma.vmem_to_hbm [thread:$0]  (%p1606_p0), %s949_s23, 128, %s951_s0, %s930_s22  }
 0x4da PF: > { %s977_s14 = sand.u32 1, %s1458_s27   ;;  %p1187_p10 = pnand %p1130_p6, %p1613_p5 }
 0x4db   : > { %s978_s25 = scalar_lea.sflag [#allocation4], %s977_s14 }
 0x4dc   : > { %p1188_p12 = pneg %p1187_p10 }
 0x4de   : > { %1449 = dma.done.wait (%p1188_p12), %s978_s25, 128  }
 0x4df   : > { %1451 = vsyncadd (%p1188_p12), %s978_s25, 4294967168  ;;  %s988_s13 = scalar_lea.sflag [#allocation10], %s977_s14 }
 0x4e0   : > { %1453 = dma.done.wait (%p1188_p12), %s988_s13, 128  }
 0x4e1   : > { %1455 = vsyncadd (%p1188_p12), %s988_s13, 4294967168  ;;  %s29_s10 = sadd.s32 1, %s1478_s10   ;;  %s1790_s0 = sld [smem:[#allocation15_spill]] }
 0x4e2   : > { %p26_p13 = scmp.ge.s32.totalorder %s29_s10, 4   ;;  %s1791_s27 = smov %s1462_s28 }
 0x4e3   : > { %s1792_s28 = smov %s1466_s29  ;;  %s1793_s29 = smov %s1611_s19 }
 0x4e4   : > { %s1794_s30 = smov %s1474_s9  ;;  %28 = sbr.rel (!%p26_p13) target bundleno = 13 (0xd), region = 124 }
 0x4e7   : > { %s1795_s9 = smov %s1790_s0 }
 0x4e9   :  { %994 = vsyncpa [#allocation3], 1 }
 0x4ea   :  { %996 = vsyncpa [#allocation3 + $0x1], 1 }
 0x4eb   :  { %997 = vsyncpa [#allocation6], 1 }
 0x4ec   :  { %998 = vsyncpa [#allocation4], 1 }
 0x4ed   :  { %1000 = vsyncpa [#allocation4 + $0x1], 1 }
 0x4ee   :  { %1001 = vsyncpa [#allocation10], 1 }
 0x4ef   :  { %1003 = vsyncpa [#allocation10 + $0x1], 1 }

</bundles_post_ra>
